<compile_context>
chip_gen: v6e
topology: v6e:2x2x1
jax: 0.10.0
libtpu: 0.0.40
codegen_flags: <defaults>
</compile_context>

<pallas_src>
import functools

import jax
import jax.numpy as jnp
from jax import lax
from jax.experimental import pallas as pl
from jax.experimental.pallas import tpu as pltpu


def _round_up(x, m):
    return ((x + m - 1) // m) * m


def _nin_kernel(x_ref, w1_ref, b1_ref, w2_ref, b2_ref, w3_ref, b3_ref, o_ref):
    # x_ref : (row_block, Cp)       bf16 -- full-im2col patch rows (all K*K taps in lanes)
    # w1_ref: (Cp, Cout_p)          bf16 -- 3x3 conv as a single GEMM
    # w2_ref, w3_ref: (Cout_p, Cout_p) bf16 -- 1x1 convs
    # b*_ref: (1, Cout_p)           f32
    # o_ref : (row_block, Cout_p)   bf16 -- lane-dense (128) output, unmasked stores
    h = jnp.dot(x_ref[...], w1_ref[...], preferred_element_type=jnp.float32)
    h = jnp.maximum(h + b1_ref[...], 0.0).astype(jnp.bfloat16)
    h = jnp.dot(h, w2_ref[...], preferred_element_type=jnp.float32)
    h = jnp.maximum(h + b2_ref[...], 0.0).astype(jnp.bfloat16)
    h = jnp.dot(h, w3_ref[...], preferred_element_type=jnp.float32)
    h = jnp.maximum(h + b3_ref[...], 0.0)
    o_ref[...] = h.astype(o_ref.dtype)


@functools.partial(jax.jit, static_argnames=("kernel_size", "padding"))
def nin_block_forward(x_nchw, params, *, kernel_size=3, padding=1):
    """NiNBlock forward. x_nchw: (N, Cin, H, W) float32 -> (N, Cout, H_out, W_out) float32."""
    w1, b1, w2, b2, w3, b3 = params      # w1: (K,K,Cin,Cout); w2/w3: (Cout,Cout); b*: (Cout,)
    N, Cin, H, W = x_nchw.shape
    K = kernel_size
    p = padding
    Cout = w1.shape[-1]
    H_out = H + 2 * p - K + 1
    W_out = W + 2 * p - K + 1
    R = H_out * W_out                               # output pixels per image

    # Note: for K*K*Cin > 128 the packed im2col layout is (up to K*K x) larger
    # than a plain channel pad; below 128 lanes (as here: 36) it is free.
    Cp = max(128, _round_up(K * K * Cin, 128))      # contraction lanes
    Cout_p = max(128, _round_up(Cout, 128))         # lane-dense output channels
    row_block = min(512, _round_up(R, 8))           # M per MXU dot; sweep 256-1024 if needed
    R_p = _round_up(R, row_block)

    # --- prep: NCHW->NHWC, spatial pad, FULL im2col (all K*K taps into lanes),
    #     lane pad to 128, bf16 cast, flatten pixels to rows.  With
    #     allow_input_fusion this is fused into the pallas_call input DMA.
    x_nhwc = jnp.transpose(x_nchw, (0, 2, 3, 1))
    xpad = jnp.pad(x_nhwc, ((0, 0), (p, p), (p, p), (0, 0)))
    taps = [xpad[:, kh:kh + H_out, kw:kw + W_out, :]
            for kh in range(K) for kw in range(K)]              # (kh, kw) tap order
    xk = jnp.concatenate(taps, axis=-1).reshape(N, R, K * K * Cin)
    xk = jnp.pad(xk, ((0, 0), (0, R_p - R), (0, Cp - K * K * Cin)))
    xk = xk.astype(jnp.bfloat16)

    # --- pack weights / biases (trace-time, tiny).  w1 flattens in (kh, kw, ci)
    #     order which matches the tap concatenation order above.
    w1k = jnp.pad(w1.reshape(K * K * Cin, Cout),
                  ((0, Cp - K * K * Cin), (0, Cout_p - Cout))).astype(jnp.bfloat16)
    w2p = jnp.pad(w2, ((0, Cout_p - Cout), (0, Cout_p - Cout))).astype(jnp.bfloat16)
    w3p = jnp.pad(w3, ((0, Cout_p - Cout), (0, Cout_p - Cout))).astype(jnp.bfloat16)
    b1p = jnp.pad(b1, (0, Cout_p - Cout)).reshape(1, Cout_p).astype(jnp.float32)
    b2p = jnp.pad(b2, (0, Cout_p - Cout)).reshape(1, Cout_p).astype(jnp.float32)
    b3p = jnp.pad(b3, (0, Cout_p - Cout)).reshape(1, Cout_p).astype(jnp.float32)

    grid = (N, R_p // row_block)   # both axes independent -> "parallel"

    out = pl.pallas_call(
        _nin_kernel,
        out_shape=jax.ShapeDtypeStruct((N, R_p, Cout_p), jnp.bfloat16),
        grid_spec=pltpu.PrefetchScalarGridSpec(
            num_scalar_prefetch=0,
            grid=grid,
            in_specs=[
                pl.BlockSpec((None, row_block, Cp), lambda n, r: (n, r, 0)),   # im2col rows
                pl.BlockSpec((Cp, Cout_p), lambda n, r: (0, 0)),               # conv1 weights
                pl.BlockSpec((1, Cout_p), lambda n, r: (0, 0)),                # b1
                pl.BlockSpec((Cout_p, Cout_p), lambda n, r: (0, 0)),           # conv2 weights
                pl.BlockSpec((1, Cout_p), lambda n, r: (0, 0)),                # b2
                pl.BlockSpec((Cout_p, Cout_p), lambda n, r: (0, 0)),           # conv3 weights
                pl.BlockSpec((1, Cout_p), lambda n, r: (0, 0)),                # b3
            ],
            out_specs=pl.BlockSpec((None, row_block, Cout_p), lambda n, r: (n, r, 0)),
        ),
        compiler_params=pltpu.CompilerParams(
            dimension_semantics=("parallel", "parallel"),
            # fuse the im2col prep into the kernel's input side instead of
            # materializing the 128-lane-inflated tensor in HBM
            allow_input_fusion=[True, False, False, False, False, False, False],
            # default scoped-VMEM limit is ample: per-step blocks ~1.5 MiB
        ),
    )(xk, w1k, b1p, w2p, b2p, w3p, b3p)

    # un-pad rows / channels, back to NCHW float32
    out = out[:, :R, :Cout].astype(jnp.float32).reshape(N, H_out, W_out, Cout)
    return jnp.transpose(out, (0, 3, 1, 2))


def init_params(key, in_channels, out_channels, kernel_size=3):
    """Deterministic synthetic parameters (shapes map 1:1 onto nn.Conv2d weights)."""
    k1, k2, k3, k4, k5, k6 = jax.random.split(key, 6)
    K = kernel_size
    # conv1: 3x3, stored HWIO (K, K, Cin, Cout)
    w1 = jax.random.normal(k1, (K, K, in_channels, out_channels), jnp.float32) * 0.1
    b1 = jax.random.normal(k2, (out_channels,), jnp.float32) * 0.1
    # conv2 / conv3: 1x1 convs == channel matmuls, stored (Cin=Cout, Cout): y = x @ w
    w2 = jax.random.normal(k3, (out_channels, out_channels), jnp.float32) * 0.1
    b2 = jax.random.normal(k4, (out_channels,), jnp.float32) * 0.1
    w3 = jax.random.normal(k5, (out_channels, out_channels), jnp.float32) * 0.1
    b3 = jax.random.normal(k6, (out_channels,), jnp.float32) * 0.1
    return (w1, b1, w2, b2, w3, b3)


def reference_forward(x_nchw, params, *, kernel_size=3, padding=1):
    """Pure-JAX f32 reference matching PyTorch Conv2d semantics (NCHW / OIHW)."""
    w1, b1, w2, b2, w3, b3 = params
    Cout = w1.shape[-1]
    hi = lax.Precision.HIGHEST
    w1_oihw = jnp.transpose(w1, (3, 2, 0, 1))              # HWIO -> OIHW
    y = lax.conv_general_dilated(
        x_nchw, w1_oihw, window_strides=(1, 1),
        padding=[(padding, padding), (padding, padding)],
        dimension_numbers=("NCHW", "OIHW", "NCHW"), precision=hi)
    y = jnp.maximum(y + b1.reshape(1, Cout, 1, 1), 0.0)
    w2_oihw = jnp.transpose(w2, (1, 0))[:, :, None, None]
    y = lax.conv_general_dilated(y, w2_oihw, (1, 1), [(0, 0), (0, 0)],
                                 dimension_numbers=("NCHW", "OIHW", "NCHW"),
                                 precision=hi)
    y = jnp.maximum(y + b2.reshape(1, Cout, 1, 1), 0.0)
    w3_oihw = jnp.transpose(w3, (1, 0))[:, :, None, None]
    y = lax.conv_general_dilated(y, w3_oihw, (1, 1), [(0, 0), (0, 0)],
                                 dimension_numbers=("NCHW", "OIHW", "NCHW"),
                                 precision=hi)
    y = jnp.maximum(y + b3.reshape(1, Cout, 1, 1), 0.0)
    return y


if __name__ == "__main__":
    key = jax.random.PRNGKey(0)
    k_x, k_p = jax.random.split(key)

    N, Cin, H, W = 2, 4, 16, 16
    Cout = 8

    x = jax.random.normal(k_x, (N, Cin, H, W), jnp.float32)
    params = init_params(k_p, Cin, Cout, kernel_size=3)

    out = jax.block_until_ready(nin_block_forward(x, params))
    ref = jax.block_until_ready(reference_forward(x, params))

    assert out.shape == (N, Cout, H, W)
    # bf16 MXU inputs / bf16 output store (f32 accumulation) vs an f32 HIGHEST
    # reference: expected max deviation ~1e-2 at these magnitudes; 5e-2 keeps a
    # wide margin while still catching structural / tap-alignment bugs.
    assert jnp.allclose(out, ref, atol=5e-2, rtol=5e-2), "mismatch vs reference"

    print("KERNEL_OK")
</pallas_src>

<mosaic_0001>
module attributes {stable_mosaic.version = 11 : i64} {
  func.func @_nin_kernel(%arg0: i32, %arg1: i32, %arg2: memref<1x256x128xbf16, #tpu.memory_space<vmem>>, %arg3: memref<128x128xbf16, #tpu.memory_space<vmem>>, %arg4: memref<1x128xf32, #tpu.memory_space<vmem>>, %arg5: memref<128x128xbf16, #tpu.memory_space<vmem>>, %arg6: memref<1x128xf32, #tpu.memory_space<vmem>>, %arg7: memref<128x128xbf16, #tpu.memory_space<vmem>>, %arg8: memref<1x128xf32, #tpu.memory_space<vmem>>, %arg9: memref<1x256x128xbf16, #tpu.memory_space<vmem>>) attributes {dimension_semantics = [#tpu.dimension_semantics<parallel>, #tpu.dimension_semantics<parallel>], iteration_bounds = array<i64: 2, 1>, scalar_prefetch = 0 : i64, scratch_operands = 0 : i64, tpu.core_type = #tpu.core_type<tc>, window_params = [{transform_indices = @transform_0, window_bounds = array<i64: 1, 256, 128>}, {pipeline_mode = #tpu.pipeline_mode<synchronous>, transform_indices = @transform_1, window_bounds = array<i64: 128, 128>}, {pipeline_mode = #tpu.pipeline_mode<synchronous>, transform_indices = @transform_2, window_bounds = array<i64: 1, 128>}, {pipeline_mode = #tpu.pipeline_mode<synchronous>, transform_indices = @transform_3, window_bounds = array<i64: 128, 128>}, {pipeline_mode = #tpu.pipeline_mode<synchronous>, transform_indices = @transform_4, window_bounds = array<i64: 1, 128>}, {pipeline_mode = #tpu.pipeline_mode<synchronous>, transform_indices = @transform_5, window_bounds = array<i64: 128, 128>}, {pipeline_mode = #tpu.pipeline_mode<synchronous>, transform_indices = @transform_6, window_bounds = array<i64: 1, 128>}, {transform_indices = @transform_7, window_bounds = array<i64: 1, 256, 128>}]} {
    %c0 = arith.constant 0 : index
    %c0_0 = arith.constant 0 : index
    %c0_1 = arith.constant 0 : index
    %0 = vector.load %arg2[%c0, %c0_0, %c0_1] : memref<1x256x128xbf16, #tpu.memory_space<vmem>>, vector<1x256x128xbf16>
    %1 = vector.shape_cast %0 : vector<1x256x128xbf16> to vector<256x128xbf16>
    %c0_2 = arith.constant 0 : index
    %c0_3 = arith.constant 0 : index
    %2 = vector.load %arg3[%c0_2, %c0_3] : memref<128x128xbf16, #tpu.memory_space<vmem>>, vector<128x128xbf16>
    %cst = arith.constant dense<0.000000e+00> : vector<256x128xf32>
    %3 = tpu.matmul %1, %2, %cst {dimension_numbers = #tpu.dot_dimension_numbers<[1], [0], [0], [1], [0, 0, 1, 1], [], []>} : vector<256x128xbf16>, vector<128x128xbf16>, vector<256x128xf32> -> vector<256x128xf32>
    %c0_4 = arith.constant 0 : index
    %c0_5 = arith.constant 0 : index
    %4 = vector.load %arg4[%c0_4, %c0_5] : memref<1x128xf32, #tpu.memory_space<vmem>>, vector<1x128xf32>
    %5 = vector.broadcast %4 : vector<1x128xf32> to vector<256x128xf32>
    %6 = arith.addf %3, %5 : vector<256x128xf32>
    %cst_6 = arith.constant 0.000000e+00 : f32
    %7 = vector.broadcast %cst_6 : f32 to vector<256x128xf32>
    %8 = arith.maximumf %6, %7 : vector<256x128xf32>
    %9 = arith.truncf %8 : vector<256x128xf32> to vector<256x128xbf16>
    %c0_7 = arith.constant 0 : index
    %c0_8 = arith.constant 0 : index
    %10 = vector.load %arg5[%c0_7, %c0_8] : memref<128x128xbf16, #tpu.memory_space<vmem>>, vector<128x128xbf16>
    %cst_9 = arith.constant dense<0.000000e+00> : vector<256x128xf32>
    %11 = tpu.matmul %9, %10, %cst_9 {dimension_numbers = #tpu.dot_dimension_numbers<[1], [0], [0], [1], [0, 0, 1, 1], [], []>} : vector<256x128xbf16>, vector<128x128xbf16>, vector<256x128xf32> -> vector<256x128xf32>
    %c0_10 = arith.constant 0 : index
    %c0_11 = arith.constant 0 : index
    %12 = vector.load %arg6[%c0_10, %c0_11] : memref<1x128xf32, #tpu.memory_space<vmem>>, vector<1x128xf32>
    %13 = vector.broadcast %12 : vector<1x128xf32> to vector<256x128xf32>
    %14 = arith.addf %11, %13 : vector<256x128xf32>
    %cst_12 = arith.constant 0.000000e+00 : f32
    %15 = vector.broadcast %cst_12 : f32 to vector<256x128xf32>
    %16 = arith.maximumf %14, %15 : vector<256x128xf32>
    %17 = arith.truncf %16 : vector<256x128xf32> to vector<256x128xbf16>
    %c0_13 = arith.constant 0 : index
    %c0_14 = arith.constant 0 : index
    %18 = vector.load %arg7[%c0_13, %c0_14] : memref<128x128xbf16, #tpu.memory_space<vmem>>, vector<128x128xbf16>
    %cst_15 = arith.constant dense<0.000000e+00> : vector<256x128xf32>
    %19 = tpu.matmul %17, %18, %cst_15 {dimension_numbers = #tpu.dot_dimension_numbers<[1], [0], [0], [1], [0, 0, 1, 1], [], []>} : vector<256x128xbf16>, vector<128x128xbf16>, vector<256x128xf32> -> vector<256x128xf32>
    %c0_16 = arith.constant 0 : index
    %c0_17 = arith.constant 0 : index
    %20 = vector.load %arg8[%c0_16, %c0_17] : memref<1x128xf32, #tpu.memory_space<vmem>>, vector<1x128xf32>
    %21 = vector.broadcast %20 : vector<1x128xf32> to vector<256x128xf32>
    %22 = arith.addf %19, %21 : vector<256x128xf32>
    %cst_18 = arith.constant 0.000000e+00 : f32
    %23 = vector.broadcast %cst_18 : f32 to vector<256x128xf32>
    %24 = arith.maximumf %22, %23 : vector<256x128xf32>
    %25 = arith.truncf %24 : vector<256x128xf32> to vector<256x128xbf16>
    %c0_19 = arith.constant 0 : index
    %c0_20 = arith.constant 0 : index
    %c0_21 = arith.constant 0 : index
    %26 = vector.load %arg9[%c0_19, %c0_20, %c0_21] : memref<1x256x128xbf16, #tpu.memory_space<vmem>>, vector<1x256x128xbf16>
    %27 = vector.shape_cast %26 : vector<1x256x128xbf16> to vector<256x128xbf16>
    %28 = vector.shape_cast %25 : vector<256x128xbf16> to vector<1x256x128xbf16>
    tpu.vector_store %arg9[%c0_19, %c0_20, %c0_21], %28 {strides = array<i32>} : memref<1x256x128xbf16, #tpu.memory_space<vmem>>, vector<1x256x128xbf16>,
    return
  }
  func.func @transform_0(%arg0: i32, %arg1: i32) -> (i32, i32, i32) {
    %c0_i32 = arith.constant 0 : i32
    %c0_i32_0 = arith.constant 0 : i32
    return %arg0, %arg1, %c0_i32 : i32, i32, i32
  }
  func.func @transform_1(%arg0: i32, %arg1: i32) -> (i32, i32) {
    %c0_i32 = arith.constant 0 : i32
    %c0_i32_0 = arith.constant 0 : i32
    %c0_i32_1 = arith.constant 0 : i32
    return %c0_i32, %c0_i32_0 : i32, i32
  }
  func.func @transform_2(%arg0: i32, %arg1: i32) -> (i32, i32) {
    %c0_i32 = arith.constant 0 : i32
    %c0_i32_0 = arith.constant 0 : i32
    %c0_i32_1 = arith.constant 0 : i32
    return %c0_i32, %c0_i32_0 : i32, i32
  }
  func.func @transform_3(%arg0: i32, %arg1: i32) -> (i32, i32) {
    %c0_i32 = arith.constant 0 : i32
    %c0_i32_0 = arith.constant 0 : i32
    %c0_i32_1 = arith.constant 0 : i32
    return %c0_i32, %c0_i32_0 : i32, i32
  }
  func.func @transform_4(%arg0: i32, %arg1: i32) -> (i32, i32) {
    %c0_i32 = arith.constant 0 : i32
    %c0_i32_0 = arith.constant 0 : i32
    %c0_i32_1 = arith.constant 0 : i32
    return %c0_i32, %c0_i32_0 : i32, i32
  }
  func.func @transform_5(%arg0: i32, %arg1: i32) -> (i32, i32) {
    %c0_i32 = arith.constant 0 : i32
    %c0_i32_0 = arith.constant 0 : i32
    %c0_i32_1 = arith.constant 0 : i32
    return %c0_i32, %c0_i32_0 : i32, i32
  }
  func.func @transform_6(%arg0: i32, %arg1: i32) -> (i32, i32) {
    %c0_i32 = arith.constant 0 : i32
    %c0_i32_0 = arith.constant 0 : i32
    %c0_i32_1 = arith.constant 0 : i32
    return %c0_i32, %c0_i32_0 : i32, i32
  }
  func.func @transform_7(%arg0: i32, %arg1: i32) -> (i32, i32, i32) {
    %c0_i32 = arith.constant 0 : i32
    %c0_i32_0 = arith.constant 0 : i32
    return %arg0, %arg1, %c0_i32 : i32, i32, i32
  }
}

</mosaic_0001>

<bundles_post_ra>
// kernel: nin_block_forward.2
= control target key start
LH: loop header
LB: loop body
LE: loop exit
PB: predicated region body
PF: predicated region fallthrough
CT: control target
= control target key end

     0   :  { %s2876_s29 = smov 0   ;;  %s2878_s30 = smov 0   ;;  %s3319_s0 = inlined_call_operand.vmem [shape: bf16[128,128], index: 0, kind: input, shape index: {}]   ;;  %s3320_s1 = inlined_call_operand.vmem [shape: f32[1,128], index: 1, kind: input, shape index: {}]   ;;  %s3321_s2 = inlined_call_operand.vmem [shape: bf16[128,128], index: 2, kind: input, shape index: {}]   ;;  %s3322_s3 = inlined_call_operand.vmem [shape: f32[1,128], index: 3, kind: input, shape index: {}]   ;;  %s3323_s4 = inlined_call_operand.vmem [shape: bf16[128,128], index: 4, kind: input, shape index: {}]   ;;  %s3324_s5 = inlined_call_operand.vmem [shape: f32[1,128], index: 5, kind: input, shape index: {}]   ;;  %s3325_s6 = inlined_call_operand.vmem [shape: bf16[2,256,36], index: 6, kind: input, shape index: {}]   ;;  %s3326_s7 = inlined_call_operand.<no memory space> [shape: bf16[], index: 7, kind: input, shape index: {}]   ;;  %s3327_s8 = inlined_call_operand.vmem [shape: bf16[2,256,128], index: 8, kind: output, shape index: {}]  }
   0x1   :  { %v13_v0 = vstv %s3326_s7  ;;  %s2880_s9 = smov 0  }
   0x2   :  { %v2874_v1 = vunpack.i.l.bf16 %v13_v0 }
   0x3 LB: > { %s35_s7 = sadd.s32 1, %s2819_s30  ;;  %p2262_p0 = scmp.ge.s32.totalorder %s2823_s9, 1  ;;  %s2823_s9 = sphi %s2880_s9, %s23_s9   ;;  %s2819_s30 = sphi %s2878_s30, %s3329_s30   ;;  %s2815_s29 = sphi %s2876_s29, %s3328_s29  }
   0x4   : > { %p37_p1 = scmp.ge.s32.totalorder %s35_s7, 2  ;;  %p264_p2 = scmp.lt.s32.totalorder %s2823_s9, 3 }
   0x6   : > { %s3331_s7 = smov (%p37_p1, %s35_s7), 0  ;;  %p265_p3 = pnand %p2262_p0, %p264_p2 }
   0x8   : > { %268 = sbr.rel (%p265_p3) target bundleno = 720 (0x2d0), region = 48 }
   0xd   : > { %v2761_v2 = vld [vmem:[%s3319_s0 + $0x38] sm:$0xff]   ;;  %p305_p4 = scmp.lt.s32.totalorder %s2815_s29, 1  ;;  %v336_v3 = vlaneseq  ;;  %v2762_v4 = vld [vmem:[%s3319_s0 + $0x30] sm:$0xff]   ;;  %v2763_v5 = vld [vmem:[%s3319_s0 + $0x28] sm:$0xff]   ;;  %v2825_v25 = vmov 0.0  }
   0xe   : > { %2576 = vmatprep.subr.bf16.mxu0 %v2761_v2  ;;  %2720 = vmatprep.subr.bf16.mxu1 %v2761_v2  ;;  %v2918_v7 = vld [vmem:[%s3319_s0 + $0x20] sm:$0xff]   ;;  %v2928_v20 = vld [vmem:[%s3319_s0 + $0x18] sm:$0xff]   ;;  %v2972_v42 = vld [vmem:[%s3319_s0 + $0x10] sm:$0xff]  }
   0xf   : > { %s3333_s29 = smov (!%p305_p4, %s2815_s29), 1  ;;  %2577 = vmatpush3.bf16.msra.mxu0 %v2761_v2  ;;  %2728 = vmatpush3.bf16.msra.mxu1 %v2761_v2  ;;  %v2906_v6 = vand.u32 127, %v336_v3  ;;  %v2997_v59 = vld [vmem:[%s3319_s0 + $0x8] sm:$0xff]  }
  0x10   : > { %2578 = vmatprep.subr.bf16.mxu0 %v2762_v4  ;;  %2721 = vmatprep.subr.bf16.mxu1 %v2762_v4  ;;  %s2375_s16 = sshll.u32 %s3333_s29, 7 }
  0x11   : > { %s2913_s19 = scalar_lea.vmem %s3325_s6, %s2375_s16  ;;  %vm339_vm0 = vcmp.lt.s32.totalorder %v2906_v6, 36  ;;  %s3264_s15 = scalar_lea.vmem %s3327_s8, %s2375_s16 }
  0x12   : > { %v333_v8 = vld [vmem:[%s2913_s19] sm:$0xff]   ;;  %v2268_v9 = vld [vmem:[%s2913_s19 + $0x8] sm:$0xff]   ;;  %v2270_v10 = vld [vmem:[%s2913_s19 + $0x10] sm:$0xff]  }
  0x13   : > { %2579 = vmatpush3.bf16.msra.mxu0 %v2762_v4  ;;  %2729 = vmatpush3.bf16.msra.mxu1 %v2762_v4  ;;  %v334_v11 = vunpack.c.l.bf16 %v333_v8  ;;  %v356_v12 = vunpack.c.h.bf16 %v333_v8  ;;  %v379_v13 = vunpack.c.l.bf16 %v2268_v9  ;;  %v402_v14 = vunpack.c.h.bf16 %v2268_v9  ;;  %v2272_v15 = vld [vmem:[%s2913_s19 + $0x18] sm:$0xff]   ;;  %v2274_v30 = vld [vmem:[%s2913_s19 + $0x20] sm:$0xff]   ;;  %v2276_v31 = vld [vmem:[%s2913_s19 + $0x28] sm:$0xff]  }
  0x14   : > { %2580 = vmatprep.subr.bf16.mxu0 %v2763_v5  ;;  %2722 = vmatprep.subr.bf16.mxu1 %v2763_v5  ;;  %v425_v16 = vunpack.c.l.bf16 %v2270_v10  ;;  %v448_v17 = vunpack.c.h.bf16 %v2270_v10  ;;  %v471_v18 = vunpack.c.l.bf16 %v2272_v15  ;;  %v494_v19 = vunpack.c.h.bf16 %v2272_v15  ;;  %v2278_v32 = vld [vmem:[%s2913_s19 + $0x30] sm:$0xff]   ;;  %v2280_v37 = vld [vmem:[%s2913_s19 + $0x38] sm:$0xff]   ;;  %v2282_v51 = vld [vmem:[%s2913_s19 + $0x40] sm:$0xff]  }
  0x15   : > { %v340_v21 = vsel %vm339_vm0, %v334_v11, %v2874_v1  ;;  %v362_v22 = vsel %vm339_vm0, %v356_v12, %v2874_v1  ;;  %v385_v23 = vsel %vm339_vm0, %v379_v13, %v2874_v1  ;;  %v408_v24 = vsel %vm339_vm0, %v402_v14, %v2874_v1  ;;  %v2284_v52 = vld [vmem:[%s2913_s19 + $0x48] sm:$0xff]   ;;  %v2286_v57 = vld [vmem:[%s2913_s19 + $0x50] sm:$0xff]   ;;  %v2992_v58 = vld [vmem:[%s2913_s19 + $0x58] sm:$0xff]  }
  0x16   : > { %v341_v26 = vpack.c.bf16 %v2825_v25, %v340_v21  ;;  %v364_v27 = vpack.c.bf16 %v2825_v25, %v362_v22  ;;  %v387_v28 = vpack.c.bf16 %v2825_v25, %v385_v23  ;;  %v410_v29 = vpack.c.bf16 %v2825_v25, %v408_v24  ;;  %v3005_v0 = vld [vmem:[%s2913_s19 + $0x60] sm:$0xff]   ;;  %v2292_v21 = vld [vmem:[%s2913_s19 + $0x68] sm:$0xff]  }
  0x17   : > { %2581 = vmatpush3.bf16.msra.mxu0 %v2763_v5  ;;  %2730 = vmatpush3.bf16.msra.mxu1 %v2763_v5  ;;  %v431_v33 = vsel %vm339_vm0, %v425_v16, %v2874_v1  ;;  %v454_v34 = vsel %vm339_vm0, %v448_v17, %v2874_v1  ;;  %v477_v35 = vsel %vm339_vm0, %v471_v18, %v2874_v1  ;;  %v517_v43 = vunpack.c.l.bf16 %v2274_v30  ;;  %v3029_v16 = vld [vmem:[%s3319_s0] sm:$0xff]  }
  0x18   : > { %2582 = vmatprep.subr.bf16.mxu0 %v2918_v7  ;;  %v500_v36 = vsel %vm339_vm0, %v494_v19, %v2874_v1  ;;  %344 = vst [vmem:[#allocation7] sm:$0xf] %v341_v26  ;;  %367 = vst [vmem:[#allocation7 + $0x4] sm:$0xf] %v364_v27  ;;  %2723 = vmatprep.subr.bf16.mxu1 %v2918_v7  ;;  %v433_v38 = vpack.c.bf16 %v2825_v25, %v431_v33  ;;  %v540_v44 = vunpack.c.h.bf16 %v2274_v30  ;;  %v2294_v27 = vld [vmem:[%s2913_s19 + $0x70] sm:$0xff]  }
  0x19   : > { %390 = vst [vmem:[#allocation7 + $0x8] sm:$0xf] %v387_v28  ;;  %413 = vst [vmem:[#allocation7 + $0xc] sm:$0xf] %v410_v29  ;;  %v456_v39 = vpack.c.bf16 %v2825_v25, %v454_v34  ;;  %v479_v40 = vpack.c.bf16 %v2825_v25, %v477_v35  ;;  %v502_v41 = vpack.c.bf16 %v2825_v25, %v500_v36  ;;  %v563_v45 = vunpack.c.l.bf16 %v2276_v31 }
  0x1a   : > { %v586_v46 = vunpack.c.h.bf16 %v2276_v31  ;;  %436 = vst [vmem:[#allocation7 + $0x10] sm:$0xf] %v433_v38  ;;  %v609_v47 = vunpack.c.l.bf16 %v2278_v32  ;;  %v632_v48 = vunpack.c.h.bf16 %v2278_v32  ;;  %v655_v49 = vunpack.c.l.bf16 %v2280_v37  ;;  %v2296_v32 = vld [vmem:[%s2913_s19 + $0x78] sm:$0xff]  }
  0x1b   : > { %2583 = vmatpush3.bf16.msra.mxu0 %v2918_v7  ;;  %459 = vst [vmem:[#allocation7 + $0x14] sm:$0xf] %v456_v39  ;;  %482 = vst [vmem:[#allocation7 + $0x18] sm:$0xf] %v479_v40  ;;  %v678_v50 = vunpack.c.h.bf16 %v2280_v37  ;;  %2731 = vmatpush3.bf16.msra.mxu1 %v2918_v7  ;;  %v523_v53 = vsel %vm339_vm0, %v517_v43, %v2874_v1  ;;  %v546_v54 = vsel %vm339_vm0, %v540_v44, %v2874_v1 }
  0x1c   : > { %2584 = vmatprep.subr.bf16.mxu0 %v2928_v20  ;;  %505 = vst [vmem:[#allocation7 + $0x1c] sm:$0xf] %v502_v41  ;;  %v569_v55 = vsel %vm339_vm0, %v563_v45, %v2874_v1  ;;  %v592_v56 = vsel %vm339_vm0, %v586_v46, %v2874_v1  ;;  %2724 = vmatprep.subr.bf16.mxu1 %v2928_v20  ;;  %v701_v12 = vunpack.c.l.bf16 %v2282_v51  ;;  %v724_v13 = vunpack.c.h.bf16 %v2282_v51 }
  0x1d   : > { %v525_v60 = vpack.c.bf16 %v2825_v25, %v523_v53  ;;  %v548_v61 = vpack.c.bf16 %v2825_v25, %v546_v54  ;;  %v571_v62 = vpack.c.bf16 %v2825_v25, %v569_v55  ;;  %v594_v63 = vpack.c.bf16 %v2825_v25, %v592_v56 }
  0x1e   : > { %v615_v2 = vsel %vm339_vm0, %v609_v47, %v2874_v1  ;;  %v638_v3 = vsel %vm339_vm0, %v632_v48, %v2874_v1  ;;  %v661_v4 = vsel %vm339_vm0, %v655_v49, %v2874_v1  ;;  %v684_v5 = vsel %vm339_vm0, %v678_v50, %v2874_v1  ;;  %v2785_v49 = vld [vmem:[%s3321_s2 + $0x38] sm:$0xff]  }
  0x1f   : > { %2585 = vmatpush3.bf16.msra.mxu0 %v2928_v20  ;;  %528 = vst [vmem:[#allocation7 + $0x20] sm:$0xf] %v525_v60  ;;  %551 = vst [vmem:[#allocation7 + $0x24] sm:$0xf] %v548_v61  ;;  %v617_v7 = vpack.c.bf16 %v2825_v25, %v615_v2  ;;  %v640_v8 = vpack.c.bf16 %v2825_v25, %v638_v3  ;;  %v663_v9 = vpack.c.bf16 %v2825_v25, %v661_v4  ;;  %v2769_v11 = vld [vmem:[#allocation7] sm:$0xff]   ;;  %v2786_v4 = vld [vmem:[%s3321_s2 + $0x30] sm:$0xff]  }
  0x20   : > { %2586 = vmatprep.subr.bf16.mxu0 %v2972_v42  ;;  %574 = vst [vmem:[#allocation7 + $0x28] sm:$0xf] %v571_v62  ;;  %597 = vst [vmem:[#allocation7 + $0x2c] sm:$0xf] %v594_v63  ;;  %v686_v10 = vpack.c.bf16 %v2825_v25, %v684_v5  ;;  %2732 = vmatpush3.bf16.msra.mxu1 %v2928_v20  ;;  %v747_v14 = vunpack.c.l.bf16 %v2284_v52  ;;  %v770_v15 = vunpack.c.h.bf16 %v2284_v52  ;;  %v793_v17 = vunpack.c.l.bf16 %v2286_v57  ;;  %v2770_v50 = vld [vmem:[#allocation7 + $0x8] sm:$0xff]  }
  0x21   : > { %2725 = vmatprep.subr.bf16.mxu1 %v2972_v42  ;;  %620 = vst [vmem:[#allocation7 + $0x30] sm:$0xf] %v617_v7  ;;  %643 = vst [vmem:[#allocation7 + $0x34] sm:$0xf] %v640_v8  ;;  %v816_v18 = vunpack.c.h.bf16 %v2286_v57  ;;  %v839_v19 = vunpack.c.l.bf16 %v2992_v58  ;;  %v862_v20 = vunpack.c.h.bf16 %v2992_v58  ;;  %2592 = vmatprep.mubr.bf16.mxu0 %v2769_v11  ;;  %v707_v22 = vsel %vm339_vm0, %v701_v12, %v2874_v1 }
  0x22   : > { %666 = vst [vmem:[#allocation7 + $0x38] sm:$0xf] %v663_v9  ;;  %689 = vst [vmem:[#allocation7 + $0x3c] sm:$0xf] %v686_v10  ;;  %v730_v23 = vsel %vm339_vm0, %v724_v13, %v2874_v1  ;;  %v753_v24 = vsel %vm339_vm0, %v747_v14, %v2874_v1  ;;  %v885_v26 = vunpack.c.l.bf16 %v3005_v0  ;;  %v709_v28 = vpack.c.bf16 %v2825_v25, %v707_v22  ;;  %v2771_v55 = vld [vmem:[#allocation7 + $0x10] sm:$0xff]   ;;  %v2787_v10 = vld [vmem:[%s3321_s2 + $0x28] sm:$0xff]  }
  0x23   : > { %2587 = vmatpush3.bf16.msra.mxu0 %v2972_v42  ;;  %v732_v29 = vpack.c.bf16 %v2825_v25, %v730_v23  ;;  %v755_v30 = vpack.c.bf16 %v2825_v25, %v753_v24  ;;  %v776_v31 = vsel %vm339_vm0, %v770_v15, %v2874_v1  ;;  %v799_v34 = vsel %vm339_vm0, %v793_v17, %v2874_v1  ;;  %v2772_v9 = vld [vmem:[#allocation7 + $0x18] sm:$0xff]   ;;  %v2788_v13 = vld [vmem:[%s3321_s2 + $0x20] sm:$0xff]   ;;  %v2791_v22 = vld [vmem:[%s3321_s2 + $0x8] sm:$0xff]  }
  0x24   : > { %2588 = vmatprep.subr.bf16.mxu0 %v2997_v59  ;;  %2733 = vmatpush3.bf16.msra.mxu1 %v2972_v42  ;;  %v778_v33 = vpack.c.bf16 %v2825_v25, %v776_v31  ;;  %v822_v35 = vsel %vm339_vm0, %v816_v18, %v2874_v1  ;;  %v845_v36 = vsel %vm339_vm0, %v839_v19, %v2874_v1  ;;  %v908_v43 = vunpack.c.h.bf16 %v3005_v0  ;;  %v2789_v15 = vld [vmem:[%s3321_s2 + $0x18] sm:$0xff]   ;;  %v2792_v23 = vld [vmem:[%s3321_s2] sm:$0xff]  }
  0x25   : > { %2726 = vmatprep.subr.bf16.mxu1 %v2997_v59  ;;  %712 = vst [vmem:[#allocation7 + $0x40] sm:$0xf] %v709_v28  ;;  %735 = vst [vmem:[#allocation7 + $0x44] sm:$0xf] %v732_v29  ;;  %v801_v37 = vpack.c.bf16 %v2825_v25, %v799_v34  ;;  %v824_v38 = vpack.c.bf16 %v2825_v25, %v822_v35  ;;  %v847_v39 = vpack.c.bf16 %v2825_v25, %v845_v36  ;;  %v2793_v24 = vld [vmem:[%s3323_s4 + $0x38] sm:$0xff]   ;;  %v2796_v28 = vld [vmem:[%s3323_s4 + $0x20] sm:$0xff]  }
  0x26   : > { %758 = vst [vmem:[#allocation7 + $0x48] sm:$0xf] %v755_v30  ;;  %v868_v40 = vsel %vm339_vm0, %v862_v20, %v2874_v1  ;;  %781 = vst [vmem:[#allocation7 + $0x4c] sm:$0xf] %v778_v33  ;;  %v891_v42 = vsel %vm339_vm0, %v885_v26, %v2874_v1  ;;  %v931_v44 = vunpack.c.l.bf16 %v2292_v21  ;;  %v954_v46 = vunpack.c.h.bf16 %v2292_v21  ;;  %v2773_v11 = vld [vmem:[#allocation7 + $0x20] sm:$0xff]   ;;  %v2790_v21 = vld [vmem:[%s3321_s2 + $0x10] sm:$0xff]  }
  0x27   : > { %2589 = vmatpush3.bf16.msra.mxu0 %v2997_v59  ;;  %v870_v41 = vpack.c.bf16 %v2825_v25, %v868_v40  ;;  %804 = vst [vmem:[#allocation7 + $0x50] sm:$0xf] %v801_v37  ;;  %827 = vst [vmem:[#allocation7 + $0x54] sm:$0xf] %v824_v38  ;;  %v893_v45 = vpack.c.bf16 %v2825_v25, %v891_v42  ;;  %v977_v47 = vunpack.c.l.bf16 %v2294_v27  ;;  %v1000_v48 = vunpack.c.h.bf16 %v2294_v27  ;;  %v2774_v14 = vld [vmem:[#allocation7 + $0x28] sm:$0xff]   ;;  %v2794_v26 = vld [vmem:[%s3323_s4 + $0x30] sm:$0xff]  }
  0x28   : > { %2590 = vmatprep.subr.bf16.mxu0 %v3029_v16  ;;  %850 = vst [vmem:[#allocation7 + $0x58] sm:$0xf] %v847_v39  ;;  %2734 = vmatpush3.bf16.msra.mxu1 %v2997_v59  ;;  %v914_v51 = vsel %vm339_vm0, %v908_v43, %v2874_v1  ;;  %v937_v52 = vsel %vm339_vm0, %v931_v44, %v2874_v1  ;;  %v1023_v53 = vunpack.c.l.bf16 %v2296_v32  ;;  %v1046_v54 = vunpack.c.h.bf16 %v2296_v32  ;;  %v2795_v27 = vld [vmem:[%s3323_s4 + $0x28] sm:$0xff]   ;;  %v2797_v29 = vld [vmem:[%s3323_s4 + $0x18] sm:$0xff]   ;;  %v3157_v33 = vld [vmem:[%s3320_s1] ss:$0 sm:$0xff] }
  0x29   : > { %873 = vst [vmem:[#allocation7 + $0x5c] sm:$0xf] %v870_v41  ;;  %2727 = vmatprep.subr.bf16.mxu1 %v3029_v16  ;;  %896 = vst [vmem:[#allocation7 + $0x60] sm:$0xf] %v893_v45  ;;  %v916_v56 = vpack.c.bf16 %v2825_v25, %v914_v51  ;;  %v939_v57 = vpack.c.bf16 %v2825_v25, %v937_v52  ;;  %v960_v58 = vsel %vm339_vm0, %v954_v46, %v2874_v1  ;;  %v2776_v19 = vld [vmem:[#allocation7 + $0x38] sm:$0xff]  }
  0x2a   : > { %v983_v59 = vsel %vm339_vm0, %v977_v47, %v2874_v1  ;;  %v962_v60 = vpack.c.bf16 %v2825_v25, %v960_v58  ;;  %v1006_v62 = vsel %vm339_vm0, %v1000_v48, %v2874_v1  ;;  %v1029_v63 = vsel %vm339_vm0, %v1023_v53, %v2874_v1 }
  0x2b   : > { %2591 = vmatpush3.bf16.msra.mxu0 %v3029_v16  ;;  %v985_v61 = vpack.c.bf16 %v2825_v25, %v983_v59  ;;  %919 = vst [vmem:[#allocation7 + $0x64] sm:$0xf] %v916_v56  ;;  %942 = vst [vmem:[#allocation7 + $0x68] sm:$0xf] %v939_v57  ;;  %v1008_v0 = vpack.c.bf16 %v2825_v25, %v1006_v62  ;;  %v1031_v2 = vpack.c.bf16 %v2825_v25, %v1029_v63 }
  0x2c   : > { %v1052_v3 = vsel %vm339_vm0, %v1046_v54, %v2874_v1  ;;  %2735 = vmatpush3.bf16.msra.mxu1 %v3029_v16  ;;  %v2777_v5 = vld [vmem:[#allocation7 + $0x40] sm:$0xff]   ;;  %965 = vst [vmem:[#allocation7 + $0x6c] sm:$0xf] %v962_v60  ;;  %v2775_v16 = vld [vmem:[#allocation7 + $0x30] sm:$0xff]   ;;  %2672 = vmatprep.subr.bf16.mxu0 %v2793_v24 }
  0x2d   : > { %988 = vst [vmem:[#allocation7 + $0x70] sm:$0xf] %v985_v61  ;;  %v1054_v7 = vpack.c.bf16 %v2825_v25, %v1052_v3  ;;  %v2778_v8 = vld [vmem:[#allocation7 + $0x48] sm:$0xff]   ;;  %1011 = vst [vmem:[#allocation7 + $0x74] sm:$0xf] %v1008_v0  ;;  %2624 = vmatprep.subr.bf16.mxu1 %v2785_v49  ;;  %2608 = vmatprep.mubr.bf16.mxu1 %v2777_v5 }
  0x2e   : > { %2593 = vmatmul.mubr.bf16.vlgmr.msra.gmra.mxu0 %v2770_v50  ;;  %1034 = vst [vmem:[#allocation7 + $0x78] sm:$0xf] %v1031_v2  ;;  %v2779_v6 = vld [vmem:[#allocation7 + $0x50] sm:$0xff]  }
  0x2f   : > { %2596 = vmatprep.mubr.bf16.mxu0 %v2771_v55  ;;  %1057 = vst [vmem:[#allocation7 + $0x7c] sm:$0xf] %v1054_v7  ;;  %2609 = vmatmul.mubr.bf16.vlgmr.msra.gmra.mxu1 %v2778_v8 }
  0x30   : > { %2612 = vmatprep.mubr.bf16.mxu1 %v2779_v6  ;;  %2625 = vmatpush3.bf16.msra.mxu1 %v2785_v49  ;;  %v2780_v25 = vld [vmem:[#allocation7 + $0x58] sm:$0xff]  }
  0x31   : > { %2626 = vmatprep.subr.bf16.mxu1 %v2786_v4  ;;  %2673 = vmatpush3.bf16.msra.mxu0 %v2793_v24 }
  0x32   : > { %v2781_v12 = vld [vmem:[#allocation7 + $0x60] sm:$0xff]   ;;  %2674 = vmatprep.subr.bf16.mxu0 %v2794_v26 }
  0x33   : > { %v2782_v17 = vld [vmem:[#allocation7 + $0x68] sm:$0xff]  }
  0x34   : > { %2627 = vmatpush3.bf16.msra.mxu1 %v2786_v4  ;;  %v2783_v18 = vld [vmem:[#allocation7 + $0x70] sm:$0xff]  }
  0x35   : > { %2628 = vmatprep.subr.bf16.mxu1 %v2787_v10  ;;  %2675 = vmatpush3.bf16.msra.mxu0 %v2794_v26 }
  0x36   : > { %2597 = vmatmul.mubr.bf16.gmra.mxu0 %v2772_v9  ;;  %v2784_v20 = vld [vmem:[#allocation7 + $0x78] sm:$0xff]   ;;  %2676 = vmatprep.subr.bf16.mxu0 %v2795_v27 }
  0x37   : > { %2600 = vmatprep.mubr.bf16.mxu0 %v2773_v11  ;;  %2613 = vmatmul.mubr.bf16.gmra.mxu1 %v2780_v25 }
  0x38   : > { %2616 = vmatprep.mubr.bf16.mxu1 %v2781_v12  ;;  %2629 = vmatpush3.bf16.msra.mxu1 %v2787_v10 }
  0x39   : > { %2630 = vmatprep.subr.bf16.mxu1 %v2788_v13  ;;  %2677 = vmatpush3.bf16.msra.mxu0 %v2795_v27 }
  0x3a   : > { %2678 = vmatprep.subr.bf16.mxu0 %v2796_v28 }
  0x3c   : > { %2631 = vmatpush3.bf16.msra.mxu1 %v2788_v13 }
  0x3d   : > { %2632 = vmatprep.subr.bf16.mxu1 %v2789_v15  ;;  %2679 = vmatpush3.bf16.msra.mxu0 %v2796_v28 }
  0x3e   : > { %2601 = vmatmul.mubr.bf16.gmra.mxu0 %v2774_v14  ;;  %2680 = vmatprep.subr.bf16.mxu0 %v2797_v29 }
  0x3f   : > { %2604 = vmatprep.mubr.bf16.mxu0 %v2775_v16  ;;  %2617 = vmatmul.mubr.bf16.gmra.mxu1 %v2782_v17 }
  0x40   : > { %2620 = vmatprep.mubr.bf16.mxu1 %v2783_v18  ;;  %2633 = vmatpush3.bf16.msra.mxu1 %v2789_v15 }
  0x41   : > { %2634 = vmatprep.subr.bf16.mxu1 %v2790_v21  ;;  %2681 = vmatpush3.bf16.msra.mxu0 %v2797_v29 }
  0x44   : > { %2635 = vmatpush3.bf16.msra.mxu1 %v2790_v21 }
  0x45   : > { %2636 = vmatprep.subr.bf16.mxu1 %v2791_v22 }
  0x46   : > { %2605 = vmatmul.mubr.bf16.gmra.mxu0 %v2776_v19 }
  0x47   : > { %2621 = vmatmul.mubr.bf16.gmra.mxu1 %v2784_v20 }
  0x48   : > { %2637 = vmatpush3.bf16.msra.mxu1 %v2791_v22 }
  0x49   : > { %2638 = vmatprep.subr.bf16.mxu1 %v2792_v23 }
  0x4c   : > { %2639 = vmatpush3.bf16.msra.mxu1 %v2792_v23 }
  0xee   : > { %v2594_v30 = vpop.f32.mrf.mxu0 }
  0xef   : > { %v3152_v32 = vpop.f32.mrf.mxu1  ;;  %v1301_v38 = vadd.f32 %v2594_v30, %v3157_v33 }
  0xf0   : > { %v1292_v31 = vpop.f32.mrf.mxu0 }
  0xf1   : > { %v1356_v35 = vpop.f32.mrf.mxu1  ;;  %v1293_v36 = vadd.f32 %v3157_v33, %v1292_v31  ;;  %v1421_v47 = vmax.f32 %v1301_v38, 0.0 }
  0xf2   : > { %v2595_v34 = vpop.f32.mrf.mxu0  ;;  %v1357_v20 = vadd.f32 %v3157_v33, %v1356_v35 }
  0xf3   : > { %v1304_v37 = vadd.f32 %v2595_v34, %v3157_v33  ;;  %v3162_v40 = vpop.f32.mrf.mxu1  ;;  %v1419_v45 = vmax.f32 %v1293_v36, 0.0 }
  0xf4   : > { %v1295_v39 = vpop.f32.mrf.mxu0  ;;  %v1435_v30 = vmax.f32 %v1357_v20, 0.0 }
  0xf5   : > { %v1296_v41 = vadd.f32 %v3157_v33, %v1295_v39  ;;  %v1422_v42 = vmax.f32 %v1304_v37, 0.0  ;;  %v1359_v44 = vpop.f32.mrf.mxu1 }
  0xf6   : > { %v2598_v43 = vpop.f32.mrf.mxu0  ;;  %v1360_v21 = vadd.f32 %v3157_v33, %v1359_v44 }
  0xf7   : > { %v1420_v46 = vmax.f32 %v1296_v41, 0.0  ;;  %v3165_v49 = vpop.f32.mrf.mxu1  ;;  %v1452_v51 = vpack.c.bf16 %v1422_v42, %v1421_v47  ;;  %v1317_v56 = vadd.f32 %v2598_v43, %v3157_v33  ;;  %v1368_v47 = vadd.f32 %v3162_v40, %v3157_v33 }
  0xf8   : > { %v1308_v48 = vpop.f32.mrf.mxu0  ;;  %v1436_v34 = vmax.f32 %v1360_v21, 0.0  ;;  %v3216_v21 = vld [vmem:[%s3322_s3] ss:$0 sm:$0xff] }
  0xf9   : > { %v1451_v50 = vpack.c.bf16 %v1420_v46, %v1419_v45  ;;  %v1372_v53 = vpop.f32.mrf.mxu1  ;;  %v1309_v54 = vadd.f32 %v3157_v33, %v1308_v48  ;;  %v1425_v2 = vmax.f32 %v1317_v56, 0.0  ;;  %v1365_v45 = vadd.f32 %v3152_v32, %v3157_v33 }
  0xfa   : > { %v2599_v52 = vpop.f32.mrf.mxu0  ;;  %v1459_v42 = vpack.c.bf16 %v1436_v34, %v1435_v30  ;;  %v1373_v43 = vadd.f32 %v3157_v33, %v1372_v53  ;;  %v1381_v32 = vadd.f32 %v3165_v49, %v3157_v33 }
  0xfb   : > { %v1320_v55 = vadd.f32 %v2599_v52, %v3157_v33  ;;  %2640 = vmatprep.mubr.bf16.mxu1 %v1451_v50  ;;  %v3170_v58 = vpop.f32.mrf.mxu1  ;;  %v1423_v63 = vmax.f32 %v1309_v54, 0.0  ;;  %v1437_v52 = vmax.f32 %v1365_v45, 0.0  ;;  %v1438_v54 = vmax.f32 %v1368_v47, 0.0 }
  0xfc   : > { %v1311_v57 = vpop.f32.mrf.mxu0  ;;  %2641 = vmatmul.mubr.bf16.vlgmr.msra.gmra.mxu1 %v1452_v51  ;;  %v1439_v50 = vmax.f32 %v1373_v43, 0.0  ;;  %v1384_v40 = vadd.f32 %v3170_v58, %v3157_v33 }
  0xfd   : > { %v1312_v59 = vadd.f32 %v3157_v33, %v1311_v57  ;;  %v1426_v60 = vmax.f32 %v1320_v55, 0.0  ;;  %v1375_v62 = vpop.f32.mrf.mxu1 }
  0xfe   : > { %v2602_v61 = vpop.f32.mrf.mxu0  ;;  %v1376_v44 = vadd.f32 %v3157_v33, %v1375_v62 }
  0xff   : > { %v1424_v0 = vmax.f32 %v1312_v59, 0.0  ;;  %v1454_v5 = vpack.c.bf16 %v1426_v60, %v1425_v2  ;;  %v3173_v8 = vpop.f32.mrf.mxu1  ;;  %v1333_v10 = vadd.f32 %v2602_v61, %v3157_v33  ;;  %v1460_v59 = vpack.c.bf16 %v1438_v54, %v1437_v52 }
 0x100   : > { %v1324_v3 = vpop.f32.mrf.mxu0  ;;  %v1440_v51 = vmax.f32 %v1376_v44, 0.0  ;;  %v1397_v49 = vadd.f32 %v3173_v8, %v3157_v33  ;;  %v2798_v8 = vld [vmem:[%s3323_s4 + $0x10] sm:$0xff]  }
 0x101   : > { %v1453_v4 = vpack.c.bf16 %v1424_v0, %v1423_v63  ;;  %v1325_v6 = vadd.f32 %v3157_v33, %v1324_v3  ;;  %v1388_v14 = vpop.f32.mrf.mxu1  ;;  %v1429_v17 = vmax.f32 %v1333_v10, 0.0  ;;  %v1441_v63 = vmax.f32 %v1381_v32, 0.0  ;;  %2682 = vmatprep.subr.bf16.mxu0 %v2798_v8 }
 0x102   : > { %v2603_v7 = vpop.f32.mrf.mxu0  ;;  %v1461_v56 = vpack.c.bf16 %v1440_v51, %v1439_v50  ;;  %v1389_v53 = vadd.f32 %v3157_v33, %v1388_v14  ;;  %v1442_v0 = vmax.f32 %v1384_v40, 0.0  ;;  %v1445_v10 = vmax.f32 %v1397_v49, 0.0  ;;  %2683 = vmatpush3.bf16.msra.mxu0 %v2798_v8 }
 0x103   : > { %v1336_v9 = vadd.f32 %v2603_v7, %v3157_v33  ;;  %2644 = vmatprep.mubr.bf16.mxu1 %v1453_v4  ;;  %v1427_v15 = vmax.f32 %v1325_v6, 0.0  ;;  %v2619_v24 = vpop.f32.mrf.mxu1 }
 0x104   : > { %v1327_v11 = vpop.f32.mrf.mxu0  ;;  %2645 = vmatmul.mubr.bf16.gmra.mxu1 %v1454_v5  ;;  %v1443_v61 = vmax.f32 %v1389_v53, 0.0  ;;  %v1462_v7 = vpack.c.bf16 %v1442_v0, %v1441_v63  ;;  %v1400_v6 = vadd.f32 %v2619_v24, %v3157_v33 }
 0x105   : > { %v1328_v25 = vadd.f32 %v3157_v33, %v1327_v11  ;;  %v1430_v12 = vmax.f32 %v1336_v9, 0.0  ;;  %v1391_v35 = vpop.f32.mrf.mxu1 }
 0x106   : > { %v2606_v13 = vpop.f32.mrf.mxu0  ;;  %v1392_v57 = vadd.f32 %v3157_v33, %v1391_v35  ;;  %v1446_v11 = vmax.f32 %v1400_v6, 0.0 }
 0x107   : > { %v1428_v16 = vmax.f32 %v1328_v25, 0.0  ;;  %v1456_v22 = vpack.c.bf16 %v1430_v12, %v1429_v17  ;;  %v1349_v28 = vadd.f32 %v2606_v13, %v3157_v33  ;;  %v2622_v48 = vpop.f32.mrf.mxu1 }
 0x108   : > { %v1340_v18 = vpop.f32.mrf.mxu0  ;;  %v1444_v62 = vmax.f32 %v1392_v57, 0.0  ;;  %v1464_v12 = vpack.c.bf16 %v1446_v11, %v1445_v10  ;;  %v1413_v13 = vadd.f32 %v2622_v48, %v3157_v33 }
 0x109   : > { %v1455_v19 = vpack.c.bf16 %v1428_v16, %v1427_v15  ;;  %v1341_v26 = vadd.f32 %v3157_v33, %v1340_v18  ;;  %v1433_v39 = vmax.f32 %v1349_v28, 0.0  ;;  %v1404_v55 = vpop.f32.mrf.mxu1  ;;  %v2799_v18 = vld [vmem:[%s3323_s4 + $0x8] sm:$0xff]  }
 0x10a   : > { %v2607_v23 = vpop.f32.mrf.mxu0  ;;  %v1463_v3 = vpack.c.bf16 %v1444_v62, %v1443_v61  ;;  %v1405_v4 = vadd.f32 %v3157_v33, %v1404_v55  ;;  %v1449_v15 = vmax.f32 %v1413_v13, 0.0  ;;  %2684 = vmatprep.subr.bf16.mxu0 %v2799_v18 }
 0x10b   : > { %v1352_v27 = vadd.f32 %v2607_v23, %v3157_v33  ;;  %2648 = vmatprep.mubr.bf16.mxu1 %v1455_v19  ;;  %v1431_v37 = vmax.f32 %v1341_v26, 0.0  ;;  %v2623_v60 = vpop.f32.mrf.mxu1  ;;  %2685 = vmatpush3.bf16.msra.mxu0 %v2799_v18 }
 0x10c   : > { %v1343_v29 = vpop.f32.mrf.mxu0  ;;  %2649 = vmatmul.mubr.bf16.gmra.mxu1 %v1456_v22  ;;  %v1447_v58 = vmax.f32 %v1405_v4, 0.0  ;;  %v1416_v14 = vadd.f32 %v2623_v60, %v3157_v33 }
 0x10d   : > { %v1344_v31 = vadd.f32 %v3157_v33, %v1343_v29  ;;  %v1434_v36 = vmax.f32 %v1352_v27, 0.0  ;;  %v1407_v2 = vpop.f32.mrf.mxu1 }
 0x10e   : > { %v1408_v5 = vadd.f32 %v3157_v33, %v1407_v2  ;;  %v1450_v16 = vmax.f32 %v1416_v14, 0.0  ;;  %v2800_v33 = vld [vmem:[%s3323_s4] sm:$0xff]  }
 0x10f   : > { %v1432_v38 = vmax.f32 %v1344_v31, 0.0  ;;  %v1458_v46 = vpack.c.bf16 %v1434_v36, %v1433_v39  ;;  %2686 = vmatprep.subr.bf16.mxu0 %v2800_v33 }
 0x110   : > { %v1448_v9 = vmax.f32 %v1408_v5, 0.0  ;;  %v1466_v17 = vpack.c.bf16 %v1450_v16, %v1449_v15  ;;  %2687 = vmatpush3.bf16.msra.mxu0 %v2800_v33 }
 0x111   : > { %v1457_v41 = vpack.c.bf16 %v1432_v38, %v1431_v37 }
 0x112   : > { %v1465_v25 = vpack.c.bf16 %v1448_v9, %v1447_v58 }
 0x113   : > { %2652 = vmatprep.mubr.bf16.mxu1 %v1457_v41 }
 0x114   : > { %2653 = vmatmul.mubr.bf16.gmra.mxu1 %v1458_v46 }
 0x115   : > { %2656 = vmatprep.mubr.bf16.mxu1 %v1459_v42 }
 0x11c   : > { %2657 = vmatmul.mubr.bf16.gmra.mxu1 %v1460_v59 }
 0x11d   : > { %2660 = vmatprep.mubr.bf16.mxu1 %v1461_v56 }
 0x124   : > { %2661 = vmatmul.mubr.bf16.gmra.mxu1 %v1462_v7 }
 0x125   : > { %2664 = vmatprep.mubr.bf16.mxu1 %v1463_v3 }
 0x12c   : > { %2665 = vmatmul.mubr.bf16.gmra.mxu1 %v1464_v12 }
 0x12d   : > { %2668 = vmatprep.mubr.bf16.mxu1 %v1465_v25 }
 0x134   : > { %2669 = vmatmul.mubr.bf16.gmra.mxu1 %v1466_v17 }
 0x1bc   : > { %v2642_v19 = vpop.f32.mrf.mxu1 }
 0x1bd   : > { %v1581_v26 = vadd.f32 %v2642_v19, %v3216_v21 }
 0x1be   : > { %v1572_v20 = vpop.f32.mrf.mxu1 }
 0x1bf   : > { %v1573_v23 = vadd.f32 %v3216_v21, %v1572_v20  ;;  %v1701_v36 = vmax.f32 %v1581_v26, 0.0 }
 0x1c0   : > { %v2643_v22 = vpop.f32.mrf.mxu1 }
 0x1c1   : > { %v1584_v24 = vadd.f32 %v2643_v22, %v3216_v21  ;;  %v1699_v31 = vmax.f32 %v1573_v23, 0.0 }
 0x1c2   : > { %v1575_v27 = vpop.f32.mrf.mxu1 }
 0x1c3   : > { %v1576_v28 = vadd.f32 %v3216_v21, %v1575_v27  ;;  %v1702_v29 = vmax.f32 %v1584_v24, 0.0 }
 0x1c4   : > { %v2646_v30 = vpop.f32.mrf.mxu1 }
 0x1c5   : > { %v1700_v34 = vmax.f32 %v1576_v28, 0.0  ;;  %v1732_v38 = vpack.c.bf16 %v1702_v29, %v1701_v36  ;;  %v1597_v43 = vadd.f32 %v2646_v30, %v3216_v21 }
 0x1c6   : > { %v1588_v35 = vpop.f32.mrf.mxu1 }
 0x1c7   : > { %v1731_v37 = vpack.c.bf16 %v1700_v34, %v1699_v31  ;;  %v1589_v41 = vadd.f32 %v3216_v21, %v1588_v35  ;;  %v1705_v51 = vmax.f32 %v1597_v43, 0.0 }
 0x1c8   : > { %v2647_v39 = vpop.f32.mrf.mxu1 }
 0x1c9   : > { %v1600_v42 = vadd.f32 %v2647_v39, %v3216_v21  ;;  %2688 = vmatprep.mubr.bf16.mxu0 %v1731_v37  ;;  %v1703_v48 = vmax.f32 %v1589_v41, 0.0 }
 0x1ca   : > { %v1591_v44 = vpop.f32.mrf.mxu1  ;;  %2689 = vmatmul.mubr.bf16.vlgmr.msra.gmra.mxu0 %v1732_v38 }
 0x1cb   : > { %v1592_v45 = vadd.f32 %v3216_v21, %v1591_v44  ;;  %v1706_v46 = vmax.f32 %v1600_v42, 0.0 }
 0x1cc   : > { %v2650_v47 = vpop.f32.mrf.mxu1 }
 0x1cd   : > { %v1704_v50 = vmax.f32 %v1592_v45, 0.0  ;;  %v1734_v55 = vpack.c.bf16 %v1706_v46, %v1705_v51  ;;  %v1613_v59 = vadd.f32 %v2650_v47, %v3216_v21 }
 0x1ce   : > { %v1604_v52 = vpop.f32.mrf.mxu1 }
 0x1cf   : > { %v1733_v54 = vpack.c.bf16 %v1704_v50, %v1703_v48  ;;  %v1605_v53 = vadd.f32 %v3216_v21, %v1604_v52  ;;  %v1709_v0 = vmax.f32 %v1613_v59, 0.0 }
 0x1d0   : > { %v2651_v56 = vpop.f32.mrf.mxu1 }
 0x1d1   : > { %v1616_v57 = vadd.f32 %v2651_v56, %v3216_v21  ;;  %2692 = vmatprep.mubr.bf16.mxu0 %v1733_v54  ;;  %v1707_v62 = vmax.f32 %v1605_v53, 0.0 }
 0x1d2   : > { %v1607_v32 = vpop.f32.mrf.mxu1  ;;  %2693 = vmatmul.mubr.bf16.gmra.mxu0 %v1734_v55 }
 0x1d3   : > { %v1608_v40 = vadd.f32 %v3216_v21, %v1607_v32  ;;  %v1710_v60 = vmax.f32 %v1616_v57, 0.0 }
 0x1d4   : > { %v2654_v61 = vpop.f32.mrf.mxu1 }
 0x1d5   : > { %v1708_v63 = vmax.f32 %v1608_v40, 0.0  ;;  %v1736_v4 = vpack.c.bf16 %v1710_v60, %v1709_v0  ;;  %v1629_v6 = vadd.f32 %v2654_v61, %v3216_v21 }
 0x1d6   : > { %v1620_v2 = vpop.f32.mrf.mxu1 }
 0x1d7   : > { %v1735_v3 = vpack.c.bf16 %v1708_v63, %v1707_v62  ;;  %v1621_v7 = vadd.f32 %v3216_v21, %v1620_v2  ;;  %v1713_v13 = vmax.f32 %v1629_v6, 0.0 }
 0x1d8   : > { %v2655_v5 = vpop.f32.mrf.mxu1 }
 0x1d9   : > { %v1632_v49 = vadd.f32 %v2655_v5, %v3216_v21  ;;  %2696 = vmatprep.mubr.bf16.mxu0 %v1735_v3  ;;  %v1711_v25 = vmax.f32 %v1621_v7, 0.0 }
 0x1da   : > { %v1623_v58 = vpop.f32.mrf.mxu1  ;;  %2697 = vmatmul.mubr.bf16.gmra.mxu0 %v1736_v4 }
 0x1db   : > { %v1624_v9 = vadd.f32 %v3216_v21, %v1623_v58  ;;  %v1714_v10 = vmax.f32 %v1632_v49, 0.0 }
 0x1dc   : > { %v2658_v11 = vpop.f32.mrf.mxu1 }
 0x1dd   : > { %v1712_v12 = vmax.f32 %v1624_v9, 0.0  ;;  %v1738_v16 = vpack.c.bf16 %v1714_v10, %v1713_v13  ;;  %v1645_v33 = vadd.f32 %v2658_v11, %v3216_v21  ;;  %v3253_v11 = vld [vmem:[%s3324_s5] ss:$0 sm:$0xff] }
 0x1de   : > { %v1636_v14 = vpop.f32.mrf.mxu1 }
 0x1df   : > { %v1737_v15 = vpack.c.bf16 %v1712_v12, %v1711_v25  ;;  %v1637_v8 = vadd.f32 %v3216_v21, %v1636_v14  ;;  %v1717_v27 = vmax.f32 %v1645_v33, 0.0 }
 0x1e0   : > { %v2659_v17 = vpop.f32.mrf.mxu1 }
 0x1e1   : > { %v1648_v18 = vadd.f32 %v2659_v17, %v3216_v21  ;;  %2700 = vmatprep.mubr.bf16.mxu0 %v1737_v15  ;;  %v1715_v24 = vmax.f32 %v1637_v8, 0.0 }
 0x1e2   : > { %v1639_v19 = vpop.f32.mrf.mxu1  ;;  %2701 = vmatmul.mubr.bf16.gmra.mxu0 %v1738_v16 }
 0x1e3   : > { %v1640_v20 = vadd.f32 %v3216_v21, %v1639_v19  ;;  %v1718_v22 = vmax.f32 %v1648_v18, 0.0 }
 0x1e4   : > { %v2662_v23 = vpop.f32.mrf.mxu1 }
 0x1e5   : > { %v1716_v26 = vmax.f32 %v1640_v20, 0.0  ;;  %v1740_v30 = vpack.c.bf16 %v1718_v22, %v1717_v27  ;;  %v1661_v35 = vadd.f32 %v2662_v23, %v3216_v21 }
 0x1e6   : > { %v1652_v28 = vpop.f32.mrf.mxu1 }
 0x1e7   : > { %v1739_v29 = vpack.c.bf16 %v1716_v26, %v1715_v24  ;;  %v1653_v34 = vadd.f32 %v3216_v21, %v1652_v28  ;;  %v1721_v44 = vmax.f32 %v1661_v35, 0.0 }
 0x1e8   : > { %v2663_v31 = vpop.f32.mrf.mxu1 }
 0x1e9   : > { %v1664_v36 = vadd.f32 %v2663_v31, %v3216_v21  ;;  %2704 = vmatprep.mubr.bf16.mxu0 %v1739_v29  ;;  %v1719_v42 = vmax.f32 %v1653_v34, 0.0 }
 0x1ea   : > { %v1655_v37 = vpop.f32.mrf.mxu1  ;;  %2705 = vmatmul.mubr.bf16.gmra.mxu0 %v1740_v30 }
 0x1eb   : > { %v1656_v38 = vadd.f32 %v3216_v21, %v1655_v37  ;;  %v1722_v39 = vmax.f32 %v1664_v36, 0.0 }
 0x1ec   : > { %v2666_v41 = vpop.f32.mrf.mxu1 }
 0x1ed   : > { %v1720_v43 = vmax.f32 %v1656_v38, 0.0  ;;  %v1742_v47 = vpack.c.bf16 %v1722_v39, %v1721_v44  ;;  %v1677_v52 = vadd.f32 %v2666_v41, %v3216_v21 }
 0x1ee   : > { %v1668_v45 = vpop.f32.mrf.mxu1 }
 0x1ef   : > { %v1741_v46 = vpack.c.bf16 %v1720_v43, %v1719_v42  ;;  %v1669_v50 = vadd.f32 %v3216_v21, %v1668_v45  ;;  %v1725_v32 = vmax.f32 %v1677_v52, 0.0 }
 0x1f0   : > { %v2667_v48 = vpop.f32.mrf.mxu1 }
 0x1f1   : > { %v1680_v51 = vadd.f32 %v2667_v48, %v3216_v21  ;;  %2708 = vmatprep.mubr.bf16.mxu0 %v1741_v46  ;;  %v1723_v57 = vmax.f32 %v1669_v50, 0.0 }
 0x1f2   : > { %v1671_v54 = vpop.f32.mrf.mxu1  ;;  %2709 = vmatmul.mubr.bf16.gmra.mxu0 %v1742_v47 }
 0x1f3   : > { %v1672_v55 = vadd.f32 %v3216_v21, %v1671_v54  ;;  %v1726_v56 = vmax.f32 %v1680_v51, 0.0 }
 0x1f4   : > { %v2670_v53 = vpop.f32.mrf.mxu1 }
 0x1f5   : > { %v1724_v59 = vmax.f32 %v1672_v55, 0.0  ;;  %v1744_v61 = vpack.c.bf16 %v1726_v56, %v1725_v32  ;;  %v1693_v2 = vadd.f32 %v2670_v53, %v3216_v21 }
 0x1f6   : > { %v1684_v40 = vpop.f32.mrf.mxu1 }
 0x1f7   : > { %v1743_v60 = vpack.c.bf16 %v1724_v59, %v1723_v57  ;;  %v1685_v63 = vadd.f32 %v3216_v21, %v1684_v40  ;;  %v1729_v6 = vmax.f32 %v1693_v2, 0.0 }
 0x1f8   : > { %v2671_v62 = vpop.f32.mrf.mxu1 }
 0x1f9   : > { %v1696_v0 = vadd.f32 %v2671_v62, %v3216_v21  ;;  %2712 = vmatprep.mubr.bf16.mxu0 %v1743_v60  ;;  %v1727_v7 = vmax.f32 %v1685_v63, 0.0 }
 0x1fa   : > { %v1687_v3 = vpop.f32.mrf.mxu1  ;;  %2713 = vmatmul.mubr.bf16.gmra.mxu0 %v1744_v61 }
 0x1fb   : > { %v1688_v4 = vadd.f32 %v3216_v21, %v1687_v3  ;;  %v1730_v5 = vmax.f32 %v1696_v0, 0.0 }
 0x1fd   : > { %v1728_v49 = vmax.f32 %v1688_v4, 0.0  ;;  %v1746_v9 = vpack.c.bf16 %v1730_v5, %v1729_v6 }
 0x1ff   : > { %v1745_v58 = vpack.c.bf16 %v1728_v49, %v1727_v7 }
 0x201   : > { %2716 = vmatprep.mubr.bf16.mxu0 %v1745_v58 }
 0x202   : > { %2717 = vmatmul.mubr.bf16.gmra.mxu0 %v1746_v9 }
 0x28a   : > { %v2690_v10 = vpop.f32.mrf.mxu0 }
 0x28b   : > { %v1861_v12 = vadd.f32 %v2690_v10, %v3253_v11 }
 0x28c   : > { %v1852_v25 = vpop.f32.mrf.mxu0 }
 0x28d   : > { %v1853_v21 = vadd.f32 %v3253_v11, %v1852_v25  ;;  %v1981_v16 = vmax.f32 %v1861_v12, 0.0 }
 0x28e   : > { %v2691_v13 = vpop.f32.mrf.mxu0 }
 0x28f   : > { %v1864_v14 = vadd.f32 %v2691_v13, %v3253_v11  ;;  %v1979_v33 = vmax.f32 %v1853_v21, 0.0 }
 0x290   : > { %v1855_v15 = vpop.f32.mrf.mxu0 }
 0x291   : > { %v1982_v17 = vmax.f32 %v1864_v14, 0.0  ;;  %v1856_v8 = vadd.f32 %v3253_v11, %v1855_v15 }
 0x292   : > { %v2694_v18 = vpop.f32.mrf.mxu0 }
 0x293   : > { %v2417_v19 = vpack.c.bf16 %v1982_v17, %v1981_v16  ;;  %v1980_v20 = vmax.f32 %v1856_v8, 0.0  ;;  %v1877_v24 = vadd.f32 %v2694_v18, %v3253_v11 }
 0x294   : > { %v1868_v22 = vpop.f32.mrf.mxu0 }
 0x295   : > { %2489 = vst [vmem:[%s3264_s15 + $0x8] sm:$0xff] %v2417_v19   ;;  %v2412_v23 = vpack.c.bf16 %v1980_v20, %v1979_v33  ;;  %v1869_v27 = vadd.f32 %v3253_v11, %v1868_v22  ;;  %v1985_v30 = vmax.f32 %v1877_v24, 0.0 }
 0x296   : > { %v2695_v26 = vpop.f32.mrf.mxu0 }
 0x297   : > { %2413 = vst [vmem:[%s3264_s15] sm:$0xff] %v2412_v23   ;;  %v1880_v28 = vadd.f32 %v2695_v26, %v3253_v11  ;;  %v1983_v35 = vmax.f32 %v1869_v27, 0.0 }
 0x298   : > { %v1871_v29 = vpop.f32.mrf.mxu0 }
 0x299   : > { %v1986_v31 = vmax.f32 %v1880_v28, 0.0  ;;  %v1872_v34 = vadd.f32 %v3253_v11, %v1871_v29 }
 0x29a   : > { %v2698_v36 = vpop.f32.mrf.mxu0 }
 0x29b   : > { %v2427_v37 = vpack.c.bf16 %v1986_v31, %v1985_v30  ;;  %v1984_v38 = vmax.f32 %v1872_v34, 0.0  ;;  %v1893_v42 = vadd.f32 %v2698_v36, %v3253_v11 }
 0x29c   : > { %v1884_v39 = vpop.f32.mrf.mxu0 }
 0x29d   : > { %2491 = vst [vmem:[%s3264_s15 + $0x18] sm:$0xff] %v2427_v37   ;;  %v2422_v41 = vpack.c.bf16 %v1984_v38, %v1983_v35  ;;  %v1885_v44 = vadd.f32 %v3253_v11, %v1884_v39  ;;  %v1989_v47 = vmax.f32 %v1893_v42, 0.0 }
 0x29e   : > { %v2699_v43 = vpop.f32.mrf.mxu0 }
 0x29f   : > { %2490 = vst [vmem:[%s3264_s15 + $0x10] sm:$0xff] %v2422_v41   ;;  %v1896_v45 = vadd.f32 %v2699_v43, %v3253_v11  ;;  %v1987_v52 = vmax.f32 %v1885_v44, 0.0 }
 0x2a0   : > { %v1887_v46 = vpop.f32.mrf.mxu0 }
 0x2a1   : > { %v1990_v48 = vmax.f32 %v1896_v45, 0.0  ;;  %v1888_v50 = vadd.f32 %v3253_v11, %v1887_v46 }
 0x2a2   : > { %v2702_v51 = vpop.f32.mrf.mxu0 }
 0x2a3   : > { %v2437_v54 = vpack.c.bf16 %v1990_v48, %v1989_v47  ;;  %v1988_v55 = vmax.f32 %v1888_v50, 0.0  ;;  %v1909_v57 = vadd.f32 %v2702_v51, %v3253_v11 }
 0x2a4   : > { %v1900_v56 = vpop.f32.mrf.mxu0 }
 0x2a5   : > { %2493 = vst [vmem:[%s3264_s15 + $0x28] sm:$0xff] %v2437_v54   ;;  %v2432_v53 = vpack.c.bf16 %v1988_v55, %v1987_v52  ;;  %v1901_v32 = vadd.f32 %v3253_v11, %v1900_v56  ;;  %v1993_v61 = vmax.f32 %v1909_v57, 0.0 }
 0x2a6   : > { %v2703_v59 = vpop.f32.mrf.mxu0 }
 0x2a7   : > { %2492 = vst [vmem:[%s3264_s15 + $0x20] sm:$0xff] %v2432_v53   ;;  %v1912_v40 = vadd.f32 %v2703_v59, %v3253_v11  ;;  %v1991_v2 = vmax.f32 %v1901_v32, 0.0 }
 0x2a8   : > { %v1903_v60 = vpop.f32.mrf.mxu0 }
 0x2a9   : > { %v1994_v62 = vmax.f32 %v1912_v40, 0.0  ;;  %v1904_v63 = vadd.f32 %v3253_v11, %v1903_v60 }
 0x2aa   : > { %v2706_v0 = vpop.f32.mrf.mxu0 }
 0x2ab   : > { %v2447_v3 = vpack.c.bf16 %v1994_v62, %v1993_v61  ;;  %v1992_v4 = vmax.f32 %v1904_v63, 0.0  ;;  %v1925_v49 = vadd.f32 %v2706_v0, %v3253_v11 }
 0x2ac   : > { %v1916_v5 = vpop.f32.mrf.mxu0 }
 0x2ad   : > { %2495 = vst [vmem:[%s3264_s15 + $0x38] sm:$0xff] %v2447_v3   ;;  %v2442_v7 = vpack.c.bf16 %v1992_v4, %v1991_v2  ;;  %v1917_v58 = vadd.f32 %v3253_v11, %v1916_v5  ;;  %v1997_v25 = vmax.f32 %v1925_v49, 0.0 }
 0x2ae   : > { %v2707_v6 = vpop.f32.mrf.mxu0 }
 0x2af   : > { %2494 = vst [vmem:[%s3264_s15 + $0x30] sm:$0xff] %v2442_v7   ;;  %v1928_v9 = vadd.f32 %v2707_v6, %v3253_v11  ;;  %v1995_v14 = vmax.f32 %v1917_v58, 0.0 }
 0x2b0   : > { %v1919_v10 = vpop.f32.mrf.mxu0 }
 0x2b1   : > { %v1998_v12 = vmax.f32 %v1928_v9, 0.0  ;;  %v1920_v13 = vadd.f32 %v3253_v11, %v1919_v10 }
 0x2b2   : > { %v2710_v21 = vpop.f32.mrf.mxu0 }
 0x2b3   : > { %v2457_v15 = vpack.c.bf16 %v1998_v12, %v1997_v25  ;;  %v1996_v16 = vmax.f32 %v1920_v13, 0.0  ;;  %v1941_v18 = vadd.f32 %v2710_v21, %v3253_v11 }
 0x2b4   : > { %v1932_v17 = vpop.f32.mrf.mxu0 }
 0x2b5   : > { %2497 = vst [vmem:[%s3264_s15 + $0x48] sm:$0xff] %v2457_v15   ;;  %v2452_v8 = vpack.c.bf16 %v1996_v16, %v1995_v14  ;;  %v1933_v19 = vadd.f32 %v3253_v11, %v1932_v17  ;;  %v2001_v23 = vmax.f32 %v1941_v18, 0.0 }
 0x2b6   : > { %v2711_v33 = vpop.f32.mrf.mxu0 }
 0x2b7   : > { %2496 = vst [vmem:[%s3264_s15 + $0x40] sm:$0xff] %v2452_v8   ;;  %v1944_v20 = vadd.f32 %v2711_v33, %v3253_v11  ;;  %v1999_v28 = vmax.f32 %v1933_v19, 0.0 }
 0x2b8   : > { %v1935_v22 = vpop.f32.mrf.mxu0 }
 0x2b9   : > { %v2002_v24 = vmax.f32 %v1944_v20, 0.0  ;;  %v1936_v26 = vadd.f32 %v3253_v11, %v1935_v22 }
 0x2ba   : > { %v2714_v27 = vpop.f32.mrf.mxu0 }
 0x2bb   : > { %v2467_v29 = vpack.c.bf16 %v2002_v24, %v2001_v23  ;;  %v2000_v30 = vmax.f32 %v1936_v26, 0.0  ;;  %v1957_v36 = vadd.f32 %v2714_v27, %v3253_v11 }
 0x2bc   : > { %v1948_v31 = vpop.f32.mrf.mxu0 }
 0x2bd   : > { %2499 = vst [vmem:[%s3264_s15 + $0x58] sm:$0xff] %v2467_v29   ;;  %v2462_v34 = vpack.c.bf16 %v2000_v30, %v1999_v28  ;;  %v1949_v37 = vadd.f32 %v3253_v11, %v1948_v31  ;;  %v2005_v41 = vmax.f32 %v1957_v36, 0.0 }
 0x2be   : > { %v2715_v35 = vpop.f32.mrf.mxu0 }
 0x2bf   : > { %2498 = vst [vmem:[%s3264_s15 + $0x50] sm:$0xff] %v2462_v34   ;;  %v1960_v38 = vadd.f32 %v2715_v35, %v3253_v11  ;;  %v2003_v45 = vmax.f32 %v1949_v37, 0.0 }
 0x2c0   : > { %v1951_v39 = vpop.f32.mrf.mxu0 }
 0x2c1   : > { %v2006_v42 = vmax.f32 %v1960_v38, 0.0  ;;  %v1952_v43 = vadd.f32 %v3253_v11, %v1951_v39 }
 0x2c2   : > { %v2718_v44 = vpop.f32.mrf.mxu0 }
 0x2c3   : > { %v2477_v46 = vpack.c.bf16 %v2006_v42, %v2005_v41  ;;  %v2004_v47 = vmax.f32 %v1952_v43, 0.0  ;;  %v1973_v51 = vadd.f32 %v2718_v44, %v3253_v11 }
 0x2c4   : > { %v1964_v48 = vpop.f32.mrf.mxu0 }
 0x2c5   : > { %2501 = vst [vmem:[%s3264_s15 + $0x68] sm:$0xff] %v2477_v46   ;;  %v2472_v50 = vpack.c.bf16 %v2004_v47, %v2003_v45  ;;  %v1965_v54 = vadd.f32 %v3253_v11, %v1964_v48  ;;  %v2009_v53 = vmax.f32 %v1973_v51, 0.0 }
 0x2c6   : > { %v2719_v52 = vpop.f32.mrf.mxu0 }
 0x2c7   : > { %2500 = vst [vmem:[%s3264_s15 + $0x60] sm:$0xff] %v2472_v50   ;;  %v1976_v55 = vadd.f32 %v2719_v52, %v3253_v11  ;;  %v2007_v32 = vmax.f32 %v1965_v54, 0.0 }
 0x2c8   : > { %v1967_v56 = vpop.f32.mrf.mxu0 }
 0x2c9   : > { %v2010_v57 = vmax.f32 %v1976_v55, 0.0  ;;  %v1968_v59 = vadd.f32 %v3253_v11, %v1967_v56 }
 0x2cb   : > { %v2487_v40 = vpack.c.bf16 %v2010_v57, %v2009_v53  ;;  %v2008_v60 = vmax.f32 %v1968_v59, 0.0 }
 0x2cd   : > { %2503 = vst [vmem:[%s3264_s15 + $0x78] sm:$0xff] %v2487_v40   ;;  %v2482_v61 = vpack.c.bf16 %v2008_v60, %v2007_v32 }
 0x2cf   : > { %2502 = vst [vmem:[%s3264_s15 + $0x70] sm:$0xff] %v2482_v61  }
 0x2d0 PF: > { %s23_s9 = sadd.s32 1, %s2823_s9   ;;  %s3328_s29 = smov %s2819_s30 }
 0x2d1   : > { %p20_p5 = scmp.ge.s32.totalorder %s23_s9, 4   ;;  %s3329_s30 = smov %s3331_s7 }
 0x2d3   :  { %22 = sbr.rel (!%p20_p5) target bundleno = 3 (0x3), region = 140 }

</bundles_post_ra>
